<compile_context>
chip_gen: v6e
topology: v6e:2x2x1
jax: 0.10.0
libtpu: 0.0.40
codegen_flags: <defaults>
</compile_context>

<pallas_src>
import functools

import jax
import jax.numpy as jnp
from jax.experimental import pallas as pl
from jax.experimental.pallas import tpu as pltpu


def _round_up(x, m):
    return (x + m - 1) // m * m


# ---------------------------------------------------------------------------
# Pallas kernel: fused (TM, K) @ (K, N_pad) + bias + sigmoid
# ---------------------------------------------------------------------------
def _linear_sigmoid_kernel(x_ref, w_ref, b_ref, o_ref):
    # bf16 x bf16 -> f32 accumulation on the MXU (K < 128 is padded internally).
    acc = jnp.dot(x_ref[...], w_ref[...], preferred_element_type=jnp.float32)
    acc = acc + b_ref[...]                       # (1, N_pad) broadcasts over rows
    # sigmoid in f32: exp and approx reciprocal both on the EUP, add on the VPU.
    o_ref[...] = pl.reciprocal(1.0 + jnp.exp(-acc), approx=True).astype(o_ref.dtype)


# ---------------------------------------------------------------------------
# One-time parameter preprocessing (torch.nn.Linear layout -> kernel layout)
# ---------------------------------------------------------------------------
def prepare_params(weight, bias):
    """weight: (num_classes, input_dim), bias: (num_classes,) — torch layout.

    Returns:
      w_pad: (K, N_pad) bf16, pre-transposed, N zero-padded to a multiple of 128.
      b_pad: (1, N_pad)  f32, zero-padded.
    K is left unpadded: a block whose leading dim equals the full array dim is
    legal, and it keeps activation HBM reads at exactly K columns.
    """
    n, k = weight.shape
    n_pad = _round_up(n, 128)
    w_pad = jnp.pad(weight.T.astype(jnp.bfloat16), ((0, 0), (0, n_pad - n)))
    b_pad = jnp.pad(bias.astype(jnp.float32), (0, n_pad - n)).reshape(1, n_pad)
    return w_pad, b_pad


# ---------------------------------------------------------------------------
# M-tile selection
# ---------------------------------------------------------------------------
_TM_LADDER = (2048, 1024, 512, 256, 128, 64, 32, 16)


def _choose_tile_m(m_pad16):
    """Pick an M tile (multiple of 16) for `m_pad16` rows (m_pad16 % 16 == 0).

    Preferences:
      * >= 2 grid steps whenever m_pad16 >= 32 (uses both v7x TensorCores with
        dimension_semantics=("parallel",); harmless no-op on v5e/v6e).
      * dead rows from rounding up to a tile multiple bounded to <= 12.5%.
      * otherwise the largest tile (fewer steps -> better DMA amortization;
        even a 2048-row step is only ~0.13 MiB in + 1 MiB out, far below any
        scoped-VMEM limit).
    """
    if m_pad16 <= 16:
        return 16
    cap = max(16, m_pad16 // 2)          # guarantees >= 2 grid steps
    for tm in _TM_LADDER:
        if tm > cap:
            continue
        waste = _round_up(m_pad16, tm) - m_pad16
        if waste * 8 <= m_pad16:         # <= 12.5% dead rows
            return tm
    return 16                            # always divides m_pad16 exactly


# ---------------------------------------------------------------------------
# Forward pass
# ---------------------------------------------------------------------------
def single_layer_classifier_fwd(x, w_pad, b_pad, *, num_classes):
    m, k = x.shape
    kw, n_pad = w_pad.shape
    assert kw == k, (kw, k)
    # Scalability guard: weight block is fully VMEM-resident (see TODO above).
    assert k * n_pad * 2 <= 8 * 1024 * 1024, (
        "weight block too large for a single VMEM-resident tile; add N/K grid axes")

    # Pad M to a multiple of 16 (bf16 sublane packing), then of the chosen tile.
    m_pad16 = _round_up(max(m, 1), 16)
    tm = _choose_tile_m(m_pad16)
    m_pad = _round_up(m_pad16, tm)

    # Single cheap wrapper op chain: bf16 cast (+ one jnp.pad of M only if needed).
    x_bf = x.astype(jnp.bfloat16)
    if m_pad != m:
        x_bf = jnp.pad(x_bf, ((0, m_pad - m), (0, 0)))

    out = pl.pallas_call(
        _linear_sigmoid_kernel,
        out_shape=jax.ShapeDtypeStruct((m_pad, n_pad), jnp.float32),
        grid=(m_pad // tm,),
        in_specs=[
            pl.BlockSpec((tm, k), lambda i: (i, 0)),        # activations (K unpadded)
            # Weight/bias blocks are grid-invariant; pl.Buffered(1) would drop
            # their second pipeline buffer, but at ~8 KiB it's negligible here.
            pl.BlockSpec((k, n_pad), lambda i: (0, 0)),     # weights (VMEM-resident)
            pl.BlockSpec((1, n_pad), lambda i: (0, 0)),     # bias
        ],
        out_specs=pl.BlockSpec((tm, n_pad), lambda i: (i, 0)),
        compiler_params=pltpu.CompilerParams(
            dimension_semantics=("parallel",)),
    )(x_bf, w_pad, b_pad)

    # Slice off padding once, at the very end (preserves torch output layout).
    # Downstream consumers that can fuse this (loss/argmax) should instead take
    # the padded (m_pad, n_pad) array directly to avoid the extra HBM pass.
    return out[:m, :num_classes]


if __name__ == "__main__":
    # Small shapes consistent with the module: batch=2, input_dim=32, classes=10.
    batch, input_dim, num_classes = 2, 32, 10

    key = jax.random.PRNGKey(0)
    kx, kw, kb = jax.random.split(key, 3)
    x = jax.random.normal(kx, (batch, input_dim), dtype=jnp.float32)
    weight = 0.1 * jax.random.normal(kw, (num_classes, input_dim), dtype=jnp.float32)
    bias = 0.1 * jax.random.normal(kb, (num_classes,), dtype=jnp.float32)

    # One-time weight preprocessing (pre-transpose / pad N / bf16 cast).
    w_pad, b_pad = prepare_params(weight, bias)

    fwd = jax.jit(functools.partial(single_layer_classifier_fwd,
                                    num_classes=num_classes))
    out = jax.block_until_ready(fwd(x, w_pad, b_pad))

    # Pure-JAX f32 reference of the torch forward: sigmoid(x @ W.T + b).
    # (bf16 inputs to the MXU diverge from the f32 torch result at ~1e-3,
    #  well inside the 2e-2 tolerance.)
    ref = jax.nn.sigmoid(x @ weight.T + bias)

    assert out.shape == (batch, num_classes), out.shape
    assert out.dtype == jnp.float32
    assert bool(jnp.all(jnp.isfinite(out)))
    assert bool(jnp.all((out > 0.0) & (out < 1.0)))
    assert bool(jnp.allclose(out, ref, atol=2e-2, rtol=2e-2))
    print("KERNEL_OK")
</pallas_src>

<mosaic_0001>
module attributes {stable_mosaic.version = 11 : i64} {
  func.func @_linear_sigmoid_kernel(%arg0: i32, %arg1: memref<16x32xbf16, #tpu.memory_space<vmem>>, %arg2: memref<32x128xbf16, #tpu.memory_space<vmem>>, %arg3: memref<1x128xf32, #tpu.memory_space<vmem>>, %arg4: memref<16x128xf32, #tpu.memory_space<vmem>>) attributes {dimension_semantics = [#tpu.dimension_semantics<parallel>], iteration_bounds = array<i64: 1>, scalar_prefetch = 0 : i64, scratch_operands = 0 : i64, tpu.core_type = #tpu.core_type<tc>, window_params = [{transform_indices = @transform_0, window_bounds = array<i64: 16, 32>}, {pipeline_mode = #tpu.pipeline_mode<synchronous>, transform_indices = @transform_1, window_bounds = array<i64: 32, 128>}, {pipeline_mode = #tpu.pipeline_mode<synchronous>, transform_indices = @transform_2, window_bounds = array<i64: 1, 128>}, {transform_indices = @transform_3, window_bounds = array<i64: 16, 128>}]} {
    %c0 = arith.constant 0 : index
    %c0_0 = arith.constant 0 : index
    %0 = vector.load %arg1[%c0, %c0_0] : memref<16x32xbf16, #tpu.memory_space<vmem>>, vector<16x32xbf16>
    %c0_1 = arith.constant 0 : index
    %c0_2 = arith.constant 0 : index
    %1 = vector.load %arg2[%c0_1, %c0_2] : memref<32x128xbf16, #tpu.memory_space<vmem>>, vector<32x128xbf16>
    %cst = arith.constant dense<0.000000e+00> : vector<16x128xf32>
    %2 = tpu.matmul %0, %1, %cst {dimension_numbers = #tpu.dot_dimension_numbers<[1], [0], [0], [1], [0, 0, 1, 1], [], []>} : vector<16x32xbf16>, vector<32x128xbf16>, vector<16x128xf32> -> vector<16x128xf32>
    %c0_3 = arith.constant 0 : index
    %c0_4 = arith.constant 0 : index
    %3 = vector.load %arg3[%c0_3, %c0_4] : memref<1x128xf32, #tpu.memory_space<vmem>>, vector<1x128xf32>
    %4 = vector.broadcast %3 : vector<1x128xf32> to vector<16x128xf32>
    %5 = arith.addf %2, %4 : vector<16x128xf32>
    %cst_5 = arith.constant 0.000000e+00 : f32
    %6 = vector.broadcast %cst_5 : f32 to vector<16x128xf32>
    %7 = arith.subf %6, %5 : vector<16x128xf32>
    %8 = math.exp %7 : vector<16x128xf32>
    %cst_6 = arith.constant 1.000000e+00 : f32
    %9 = vector.broadcast %cst_6 : f32 to vector<16x128xf32>
    %10 = arith.addf %9, %8 : vector<16x128xf32>
    %11 = tpu.reciprocal %10 {approx = true} : vector<16x128xf32> -> vector<16x128xf32>
    %c0_7 = arith.constant 0 : index
    %c0_8 = arith.constant 0 : index
    %12 = vector.load %arg4[%c0_7, %c0_8] : memref<16x128xf32, #tpu.memory_space<vmem>>, vector<16x128xf32>
    tpu.vector_store %arg4[%c0_7, %c0_8], %11 {strides = array<i32>} : memref<16x128xf32, #tpu.memory_space<vmem>>, vector<16x128xf32>,
    return
  }
  func.func @transform_0(%arg0: i32) -> (i32, i32) {
    %c0_i32 = arith.constant 0 : i32
    %c0_i32_0 = arith.constant 0 : i32
    return %arg0, %c0_i32 : i32, i32
  }
  func.func @transform_1(%arg0: i32) -> (i32, i32) {
    %c0_i32 = arith.constant 0 : i32
    %c0_i32_0 = arith.constant 0 : i32
    %c0_i32_1 = arith.constant 0 : i32
    return %c0_i32, %c0_i32_0 : i32, i32
  }
  func.func @transform_2(%arg0: i32) -> (i32, i32) {
    %c0_i32 = arith.constant 0 : i32
    %c0_i32_0 = arith.constant 0 : i32
    %c0_i32_1 = arith.constant 0 : i32
    return %c0_i32, %c0_i32_0 : i32, i32
  }
  func.func @transform_3(%arg0: i32) -> (i32, i32) {
    %c0_i32 = arith.constant 0 : i32
    %c0_i32_0 = arith.constant 0 : i32
    return %arg0, %c0_i32 : i32, i32
  }
}

</mosaic_0001>

<bundles_post_ra>
// kernel: single_layer_classifier_fwd.1
= control target key start
LH: loop header
LB: loop body
LE: loop exit
PB: predicated region body
PF: predicated region fallthrough
CT: control target
= control target key end

     0   :  { %8 = vsyncpa [#allocation3], 0  ;;  %s175_s12 = smov [#allocation2]   ;;  %s215_s0 = inlined_call_operand.vmem [shape: bf16[16,32], index: 0, kind: input, shape index: {}]   ;;  %s216_s1 = inlined_call_operand.hbm [shape: bf16[32,128], index: 1, kind: input, shape index: {}]   ;;  %s217_s2 = inlined_call_operand.vmem [shape: f32[1,128], index: 2, kind: input, shape index: {}]   ;;  %s218_s3 = inlined_call_operand.vmem [shape: f32[16,128], index: 3, kind: output, shape index: {}]  }
   0x1   :  { %s16_s13 = sshll.u32 %s175_s12, 4  ;;  %s17_s13 = int_to_ptr.vmem [resolvable:$true] %s16_s13 }
   0x2   :  { %s161_s14 = scalar_lea.vmem %s17_s13, 256  ;;  %p166_p1 = scmp.lt.s32.totalorder %s17_s13, %s17_s13 }
   0x3   :  { %p162_p0 = scmp.ne.s32.totalorder %s17_s13, %s161_s14  ;;  %p167_p2 = scmp.lt.s32.totalorder %s161_s14, %s161_s14 }
   0x5   :  { %p168_p3 = por %p167_p2, %p166_p1 }
   0x7   :  { %p169_p4 = pnand %p168_p3, %p162_p0 }
   0x9   :  { %172 = shalt.err (!%p169_p4)
}
   0xa   :  { %s176_s15 = smov 64   ;;  %s177_s16 = smov 4  }
   0xb   :  { %22 = dma.hbm_to_vmem [thread:$0]  %s216_s1, 256, %s17_s13, [#allocation3], %s176_s15, %s176_s15, %s177_s16  }
   0xc   :  { %173 = dma.done.wait [#allocation3], 256  }
   0xd   :  { %174 = vsyncadd [#allocation3], 4294967040  ;;  %v178_v0 = vmov 0.0   ;;  %vm179_vm0 = vmmov 0   ;;  %v142_v1 = vld [vmem:[#allocation2 + $0x8] sm:$0xff]   ;;  %v143_v2 = vld [vmem:[#allocation2] sm:$0xff]  }
   0xe   :  { %129 = vmatprep.subr.bf16.mxu0 %v178_v0  ;;  %133 = vmatprep.mubr.msk.bf16.mxu0 %vm179_vm0, %v178_v0  ;;  %v144_v3 = vld [vmem:[%s215_s0] sm:$0xff]   ;;  %vm59_vm1 = vcmask 261120  }
   0xf   :  { %130 = vmatpush3.bf16.msra.mxu0 %v142_v1  ;;  %v121_v4 = vld [vmem:[%s217_s2] ss:$0 sm:$0xff] }
  0x10   :  { %131 = vmatprep.subr.bf16.mxu0 %v178_v0 }
  0x13   :  { %132 = vmatpush3.bf16.msra.mxu0 %v143_v2 }
  0x16   :  { %134 = vmatmul.mubr.msk.bf16.vlgmr.msra.gmra.mxu0 %vm59_vm1, %v144_v3 }
  0xd6   :  { %v97_v5 = vpop.f32.mrf.mxu0 }
  0xd7   :  { %v98_v6 = vadd.f32 %v121_v4, %v97_v5 }
  0xd8   :  { %v135_v7 = vpop.f32.mrf.mxu0 }
  0xd9   :  { %v104_v8 = vsub.f32 0.0, %v98_v6 }
  0xda   :  { %v100_v9 = vpop.f32.mrf.mxu0 }
  0xdb   :  { %v106_v10 = vmul.f32 1.442695, %v104_v8  ;;  %v101_v11 = vadd.f32 %v121_v4, %v100_v9 }
  0xdc   :  { %v136_v12 = vpop.f32.mrf.mxu0 }
  0xdd   :  { %145 = vpow2.f32 %v106_v10  ;;  %v105_v13 = vsub.f32 0.0, %v101_v11 }
  0xdf   :  { %v108_v14 = vmul.f32 1.442695, %v105_v13 }
  0xe1   :  { %147 = vpow2.f32 %v108_v14 }
  0xea   :  { %v146_v15 = vpop.eup %145 }
  0xeb   :  { %v110_v16 = vadd.f32 1.0, %v146_v15 }
  0xed   :  { %149 = vrcp.f32 %v110_v16 }
  0xee   :  { %v148_v17 = vpop.eup %147 }
  0xef   :  { %v111_v18 = vadd.f32 1.0, %v148_v17 }
  0xf1   :  { %151 = vrcp.f32 %v111_v18 }
  0xfa   :  { %v150_v19 = vpop.eup %149 }
  0xfb   :  { %114 = vst [vmem:[%s218_s3] sm:$0xff] %v150_v19 }
  0xfe   :  { %v152_v20 = vpop.eup %151 }
  0xff   :  { %115 = vst [vmem:[%s218_s3 + $0x8] sm:$0xff] %v152_v20 }
 0x100   :  { %120 = vsyncpa [#allocation3], 1 }

</bundles_post_ra>
